<compile_context>
chip_gen: v7x
topology: tpu7x:2x2x1
jax: 0.10.0
libtpu: 0.0.40
codegen_flags: <defaults>
</compile_context>

<pallas_src>
import jax
import jax.numpy as jnp
from jax.experimental import pallas as pl
from jax.experimental.pallas import tpu as pltpu


def _mlp_kernel(x_ref, w1_ref, b1_ref, w2_ref, b2_ref, o_ref):
    # hidden = leaky_relu(x @ w1 + b1)   (negative_slope = 0.01, torch default)
    h = jnp.dot(x_ref[...], w1_ref[...], preferred_element_type=jnp.float32)
    h = h + b1_ref[...]                       # (1, H) broadcasts over batch tile
    h = jnp.maximum(h, 0.01 * h)              # single vmul+vmax on the VPU
    # out = hidden @ w2 + b2   (feed hidden back to the MXU in bf16)
    out = jnp.dot(h.astype(w2_ref.dtype), w2_ref[...],
                  preferred_element_type=jnp.float32)
    out = out + b2_ref[...]                   # (1, O) broadcasts over batch tile
    o_ref[...] = out.astype(o_ref.dtype)


def net_forward(x, w1, b1, w2, b2, *, tm=1024):
    """Pallas implementation of Net.forward: predict(leaky_relu(hidden(x)))."""
    B, F = x.shape
    H = w1.shape[1]
    O = w2.shape[1]

    # bf16 MXU inputs (the kernel is HBM-bound on x at large B), f32 biases.
    xb = x.astype(jnp.bfloat16)
    w1b = w1.astype(jnp.bfloat16)
    w2b = w2.astype(jnp.bfloat16)
    b1f = b1.astype(jnp.float32)
    b2f = b2.astype(jnp.float32)

    # Batch tiling: small batches use a single full-array block (always legal);
    # large batches stream TM-row tiles through a parallel grid.
    if B <= tm:
        TM = B
        Bp = B
    else:
        TM = tm                      # multiple of 8 (sublane-aligned)
        Bp = pl.cdiv(B, TM) * TM
        if Bp != B:
            xb = jnp.pad(xb, ((0, Bp - B), (0, 0)))
    grid_m = Bp // TM

    cost = pl.CostEstimate(
        flops=2 * Bp * (F * H + H * O),
        transcendentals=0,
        bytes_accessed=(Bp * F * 2 + F * H * 2 + H * 4
                        + H * O * 2 + O * 4 + Bp * O * 4),
    )

    out = pl.pallas_call(
        _mlp_kernel,
        out_shape=jax.ShapeDtypeStruct((Bp, O), jnp.float32),
        grid_spec=pl.GridSpec(
            grid=(grid_m,),
            in_specs=[
                pl.BlockSpec((TM, F), lambda i: (i, 0)),   # streamed batch tile
                pl.BlockSpec((F, H), lambda i: (0, 0)),    # VMEM-resident weights
                pl.BlockSpec((1, H), lambda i: (0, 0)),
                pl.BlockSpec((H, O), lambda i: (0, 0)),
                pl.BlockSpec((1, O), lambda i: (0, 0)),
            ],
            out_specs=pl.BlockSpec((TM, O), lambda i: (i, 0)),
        ),
        compiler_params=pltpu.CompilerParams(
            # Batch tiles are independent -> shard across both TCs on v7x;
            # neutral on single-TC v5e/v6e.
            dimension_semantics=("parallel",),
        ),
        cost_estimate=cost,
    )(xb, w1b, b1f, w2b, b2f)

    return out[:B] if Bp != B else out


def init_params(key, n_feature, n_hidden, n_output):
    """Deterministic init mirroring torch.nn.Linear's U(-1/sqrt(fan_in), +1/sqrt(fan_in))."""
    k1, k2, k3, k4 = jax.random.split(key, 4)
    bound1 = 1.0 / (n_feature ** 0.5)
    bound2 = 1.0 / (n_hidden ** 0.5)
    # stored as (in, out) — transpose of torch's (out, in)
    w1 = jax.random.uniform(k1, (n_feature, n_hidden), jnp.float32, -bound1, bound1)
    b1 = jax.random.uniform(k2, (1, n_hidden), jnp.float32, -bound1, bound1)
    w2 = jax.random.uniform(k3, (n_hidden, n_output), jnp.float32, -bound2, bound2)
    b2 = jax.random.uniform(k4, (1, n_output), jnp.float32, -bound2, bound2)
    return w1, b1, w2, b2


def _reference(x, w1, b1, w2, b2):
    # Plain-JAX reference mirroring the kernel's numerics (bf16 MXU inputs,
    # f32 accumulation / elementwise).
    xb = x.astype(jnp.bfloat16)
    w1b = w1.astype(jnp.bfloat16)
    w2b = w2.astype(jnp.bfloat16)
    h = jnp.dot(xb, w1b, preferred_element_type=jnp.float32) + b1
    h = jnp.maximum(h, 0.01 * h)
    return jnp.dot(h.astype(jnp.bfloat16), w2b,
                   preferred_element_type=jnp.float32) + b2


if __name__ == "__main__":
    n_feature, n_hidden, n_output = 16, 32, 4

    key = jax.random.PRNGKey(0)
    kx, kp, kx2 = jax.random.split(key, 3)
    w1, b1, w2, b2 = init_params(kp, n_feature, n_hidden, n_output)

    # Small-batch check (single grid step).
    batch = 8
    x = jax.random.normal(kx, (batch, n_feature), jnp.float32)
    out = jax.block_until_ready(net_forward(x, w1, b1, w2, b2))
    ref = _reference(x, w1, b1, w2, b2)
    assert out.shape == (batch, n_output)
    assert jnp.allclose(out, ref, atol=1e-3, rtol=1e-3)

    # Larger-batch check exercising the batch grid (grid_m > 1) + ragged tail.
    batch2 = 2048 + 40
    x2 = jax.random.normal(kx2, (batch2, n_feature), jnp.float32)
    out2 = jax.block_until_ready(net_forward(x2, w1, b1, w2, b2, tm=512))
    ref2 = _reference(x2, w1, b1, w2, b2)
    assert out2.shape == (batch2, n_output)
    assert jnp.allclose(out2, ref2, atol=1e-3, rtol=1e-3)

    print("KERNEL_OK")
</pallas_src>

<mosaic_0001>
module attributes {stable_mosaic.version = 11 : i64} {
  func.func @_mlp_kernel(%arg0: i32, %arg1: memref<8x16xbf16, #tpu.memory_space<vmem>>, %arg2: memref<16x32xbf16, #tpu.memory_space<vmem>>, %arg3: memref<1x32xf32, #tpu.memory_space<vmem>>, %arg4: memref<32x4xbf16, #tpu.memory_space<vmem>>, %arg5: memref<1x4xf32, #tpu.memory_space<vmem>>, %arg6: memref<8x4xf32, #tpu.memory_space<vmem>>) attributes {dimension_semantics = [#tpu.dimension_semantics<parallel>], iteration_bounds = array<i64: 1>, scalar_prefetch = 0 : i64, scratch_operands = 0 : i64, tpu.core_type = #tpu.core_type<tc>, window_params = [{transform_indices = @transform_0, window_bounds = array<i64: 8, 16>}, {pipeline_mode = #tpu.pipeline_mode<synchronous>, transform_indices = @transform_1, window_bounds = array<i64: 16, 32>}, {pipeline_mode = #tpu.pipeline_mode<synchronous>, transform_indices = @transform_2, window_bounds = array<i64: 1, 32>}, {pipeline_mode = #tpu.pipeline_mode<synchronous>, transform_indices = @transform_3, window_bounds = array<i64: 32, 4>}, {pipeline_mode = #tpu.pipeline_mode<synchronous>, transform_indices = @transform_4, window_bounds = array<i64: 1, 4>}, {transform_indices = @transform_5, window_bounds = array<i64: 8, 4>}]} {
    %c0 = arith.constant 0 : index
    %c0_0 = arith.constant 0 : index
    %0 = vector.load %arg1[%c0, %c0_0] : memref<8x16xbf16, #tpu.memory_space<vmem>>, vector<8x16xbf16>
    %c0_1 = arith.constant 0 : index
    %c0_2 = arith.constant 0 : index
    %1 = vector.load %arg2[%c0_1, %c0_2] : memref<16x32xbf16, #tpu.memory_space<vmem>>, vector<16x32xbf16>
    %cst = arith.constant dense<0.000000e+00> : vector<8x32xf32>
    %2 = tpu.matmul %0, %1, %cst {dimension_numbers = #tpu.dot_dimension_numbers<[1], [0], [0], [1], [0, 0, 1, 1], [], []>} : vector<8x16xbf16>, vector<16x32xbf16>, vector<8x32xf32> -> vector<8x32xf32>
    %c0_3 = arith.constant 0 : index
    %c0_4 = arith.constant 0 : index
    %3 = vector.load %arg3[%c0_3, %c0_4] : memref<1x32xf32, #tpu.memory_space<vmem>>, vector<1x32xf32>
    %4 = vector.broadcast %3 : vector<1x32xf32> to vector<8x32xf32>
    %5 = arith.addf %2, %4 : vector<8x32xf32>
    %cst_5 = arith.constant 0.00999999977 : f32
    %6 = vector.broadcast %cst_5 : f32 to vector<8x32xf32>
    %7 = arith.mulf %6, %5 : vector<8x32xf32>
    %8 = arith.maximumf %5, %7 : vector<8x32xf32>
    %9 = arith.truncf %8 : vector<8x32xf32> to vector<8x32xbf16>
    %c0_6 = arith.constant 0 : index
    %c0_7 = arith.constant 0 : index
    %10 = vector.load %arg4[%c0_6, %c0_7] : memref<32x4xbf16, #tpu.memory_space<vmem>>, vector<32x4xbf16>
    %cst_8 = arith.constant dense<0.000000e+00> : vector<8x4xf32>
    %11 = tpu.matmul %9, %10, %cst_8 {dimension_numbers = #tpu.dot_dimension_numbers<[1], [0], [0], [1], [0, 0, 1, 1], [], []>} : vector<8x32xbf16>, vector<32x4xbf16>, vector<8x4xf32> -> vector<8x4xf32>
    %c0_9 = arith.constant 0 : index
    %c0_10 = arith.constant 0 : index
    %12 = vector.load %arg5[%c0_9, %c0_10] : memref<1x4xf32, #tpu.memory_space<vmem>>, vector<1x4xf32>
    %13 = vector.broadcast %12 : vector<1x4xf32> to vector<8x4xf32>
    %14 = arith.addf %11, %13 : vector<8x4xf32>
    %c0_11 = arith.constant 0 : index
    %c0_12 = arith.constant 0 : index
    %15 = vector.load %arg6[%c0_11, %c0_12] : memref<8x4xf32, #tpu.memory_space<vmem>>, vector<8x4xf32>
    tpu.vector_store %arg6[%c0_11, %c0_12], %14 {strides = array<i32>} : memref<8x4xf32, #tpu.memory_space<vmem>>, vector<8x4xf32>,
    return
  }
  func.func @transform_0(%arg0: i32) -> (i32, i32) {
    %c0_i32 = arith.constant 0 : i32
    %c0_i32_0 = arith.constant 0 : i32
    return %arg0, %c0_i32 : i32, i32
  }
  func.func @transform_1(%arg0: i32) -> (i32, i32) {
    %c0_i32 = arith.constant 0 : i32
    %c0_i32_0 = arith.constant 0 : i32
    %c0_i32_1 = arith.constant 0 : i32
    return %c0_i32, %c0_i32_0 : i32, i32
  }
  func.func @transform_2(%arg0: i32) -> (i32, i32) {
    %c0_i32 = arith.constant 0 : i32
    %c0_i32_0 = arith.constant 0 : i32
    %c0_i32_1 = arith.constant 0 : i32
    return %c0_i32, %c0_i32_0 : i32, i32
  }
  func.func @transform_3(%arg0: i32) -> (i32, i32) {
    %c0_i32 = arith.constant 0 : i32
    %c0_i32_0 = arith.constant 0 : i32
    %c0_i32_1 = arith.constant 0 : i32
    return %c0_i32, %c0_i32_0 : i32, i32
  }
  func.func @transform_4(%arg0: i32) -> (i32, i32) {
    %c0_i32 = arith.constant 0 : i32
    %c0_i32_0 = arith.constant 0 : i32
    %c0_i32_1 = arith.constant 0 : i32
    return %c0_i32, %c0_i32_0 : i32, i32
  }
  func.func @transform_5(%arg0: i32) -> (i32, i32) {
    %c0_i32 = arith.constant 0 : i32
    %c0_i32_0 = arith.constant 0 : i32
    return %arg0, %c0_i32 : i32, i32
  }
}

</mosaic_0001>

<bundles_post_ra>
// kernel: tpu_custom_call.1
= control target key start
LH: loop header
LB: loop body
LE: loop exit
PB: predicated region body
PF: predicated region fallthrough
CT: control target
= control target key end

     0   :  { %v188_v0 = vmov 0.0   ;;  %vm189_vm0 = vmmov 0   ;;  %vm37_vm1 = vcmask 130048   ;;  %vm107_vm2 = vcmask 261120   ;;  %s241_s1 = inlined_call_operand.vmem [shape: bf16[16,32], index: 1, kind: input, shape index: {}]   ;;  %s242_s0 = inlined_call_operand.vmem [shape: bf16[8,16], index: 0, kind: input, shape index: {}]   ;;  %s243_s3 = inlined_call_operand.vmem [shape: bf16[32,4], index: 3, kind: input, shape index: {}]   ;;  %s244_s2 = inlined_call_operand.vmem [shape: f32[1,32], index: 2, kind: input, shape index: {}]   ;;  %s245_s4 = inlined_call_operand.vmem [shape: f32[1,4], index: 4, kind: input, shape index: {}]   ;;  %s246_s5 = inlined_call_operand.vmem [shape: f32[8,4], index: 5, kind: output, shape index: {}]  }
   0x1   :  { %169 = vmatprep.subr.bf16.mxu0 %v188_v0  ;;  %v185_v1 = vld [vmem:[%s241_s1] sm:$0xff]   ;;  %171 = vmatprep.mubr.msk.bf16.mxu0 %vm189_vm0, %v188_v0  ;;  %v187_v4 = vld [vmem:[%s243_s3 + $0x8] sm:$0xff]   ;;  %vm151_vm3 = vcmask 31744  }
   0x2   :  { %175 = vmatprep.subr.bf16.mxu1 %v188_v0  ;;  %179 = vmatprep.mubr.msk.bf16.mxu1 %vm189_vm0, %v188_v0  ;;  %v21_v2 = vld [vmem:[%s242_s0] sm:$0xf] }
   0x3   :  { %170 = vmatpush3.bf16.msra.mxu0 %v185_v1  ;;  %v186_v3 = vld [vmem:[%s243_s3] sm:$0xff]  }
   0x4   :  { %176 = vmatpush3.bf16.msra.mxu1 %v186_v3  ;;  %v157_v5 = vld [vmem:[%s244_s2] ss:$0 sm:$0xff] }
   0x5   :  { %177 = vmatprep.subr.bf16.mxu1 %v188_v0  ;;  %v160_v14 = vld [vmem:[%s245_s4] ss:$0 sm:$0xff] }
   0x6   :  { %172 = vmatmul.mubr.msk.bf16.vlgmr.msra.gmra.mrb[0].mxu0 %vm37_vm1, %v21_v2 }
   0x8   :  { %178 = vmatpush3.bf16.msra.mxu1 %v187_v4 }
  0xd9   :  { %v75_v6 = vpop.f32.mrb[0].mxu0 }
  0xda   :  { %v76_v7 = vadd.f32 %v157_v5, %v75_v6  ;;  %v173_v8 = vpop.f32.mrb[1].mxu0 }
  0xdb   :  { %v78_v9 = vpop.f32.mrb[2].mxu0 }
  0xdc   :  { %v81_v10 = vmul.f32 0.01, %v76_v7  ;;  %v174_v11 = vpop.f32.mrb[3].mxu0 }
  0xde   :  { %v82_v12 = vmax.f32 %v76_v7, %v81_v10 }
  0xe0   :  { %v83_v13 = vpack.c.bf16 %v82_v12, %v82_v12 }
  0xe2   :  { %180 = vmatmul.mubr.msk.bf16.vlgmr.msra.gmra.mrb[0].mxu1 %vm107_vm2, %v83_v13 }
 0x1b5   :  { %v145_v15 = vpop.f32.mrb[0].mxu1 }
 0x1b6   :  { %v146_v16 = vadd.f32 %v160_v14, %v145_v15  ;;  %v181_v17 = vpop.f32.mrb[1].mxu1 }
 0x1b7   :  { %v148_v18 = vpop.f32.mrb[2].mxu1 }
 0x1b8   :  { %152 = vst.msk [vmem:[%s246_s5] sm:$0xff] %vm151_vm3, %v146_v16  ;;  %v182_v19 = vpop.f32.mrb[3].mxu1 }

</bundles_post_ra>
